<compile_context>
chip_gen: v7x
topology: tpu7x:2x2x1
jax: 0.10.0
libtpu: 0.0.40
codegen_flags: <defaults>
</compile_context>

<pallas_src>
import itertools

import numpy as np
import jax
import jax.numpy as jnp
from jax.experimental import pallas as pl
from jax.experimental.pallas import tpu as pltpu


def _round_up(n, m):
    return ((n + m - 1) // m) * m


def rules_kernel(x_ref, sel_ref, o_ref):
    # x_ref:  (V, Tb, M)  VMEM  -- per-variable membership degrees, batch tile
    # sel_ref:(V, M, Rp)  VMEM  -- one-hot selectors, sel[v, m, r] = [mf_idx[r,v]==m]
    # o_ref:  (Tb, Rp)    VMEM  -- rule firing strengths (lane-dense, Rp % 128 == 0)
    num_vars, _, num_mfs = x_ref.shape
    acc = None
    for v in range(num_vars):              # static unroll (V is small)
        xv = x_ref[v]                      # (Tb, M)  leading-dim view
        sv = sel_ref[v]                    # (M, Rp)
        # One-hot select on the VPU: ant[b, r] = sum_m xv[b, m] * sv[m, r].
        # sel is 0/1 so this is an exact gather; pure VALU mul/add, no MXU.
        ant = xv[:, 0:1] * sv[0:1, :]      # (Tb, Rp)
        for m in range(1, num_mfs):
            ant = ant + xv[:, m:m + 1] * sv[m:m + 1, :]
        acc = ant if acc is None else acc * ant
    o_ref[...] = acc.astype(o_ref.dtype)


def rules_layer(x, sel, num_rules, *, block_b=256):
    """x: (B, V, M) f32, sel: (V, M, Rp) f32 one-hot -> (B, num_rules) f32."""
    B, V, M = x.shape
    Rp = sel.shape[-1]

    # Batch tile: multiple of 8 sublanes; pad B up to a multiple of it.
    tb = min(block_b, _round_up(B, 8))
    Bp = _round_up(B, tb)

    # Re-layout so per-variable access inside the kernel is a leading-dim view.
    xt = jnp.transpose(x, (1, 0, 2))                     # (V, B, M)
    if Bp != B:
        xt = jnp.pad(xt, ((0, 0), (0, Bp - B), (0, 0)))  # padded rows sliced off below

    out = pl.pallas_call(
        rules_kernel,
        out_shape=jax.ShapeDtypeStruct((Bp, Rp), x.dtype),
        grid=(Bp // tb,),
        in_specs=[
            # x: one batch tile per grid step
            pl.BlockSpec((V, tb, M), lambda i: (0, i, 0)),
            # sel: constant block index -> stays resident in VMEM across tiles
            pl.BlockSpec((V, M, Rp), lambda i: (0, 0, 0)),
        ],
        out_specs=pl.BlockSpec((tb, Rp), lambda i: (i, 0)),
        compiler_params=pltpu.CompilerParams(
            dimension_semantics=("parallel",)),   # batch tiles are independent
    )(xt, sel)

    return out[:B, :num_rules]


def build_selector(mf_num, M, lane=128):
    """Deterministic rule index table + one-hot selectors padded to 128 lanes."""
    mf_idx = np.array(list(itertools.product(*[range(n) for n in mf_num])),
                      dtype=np.int32)                     # (R, V)
    R, V = mf_idx.shape
    Rp = _round_up(R, lane)
    sel = np.zeros((V, M, Rp), dtype=np.float32)
    sel[np.arange(V)[None, :], mf_idx, np.arange(R)[:, None]] = 1.0
    return mf_idx, sel, R


def rules_ref(x, mf_idx):
    """Pure-JAX reference matching torch gather + prod semantics."""
    B, V, M = x.shape
    R = mf_idx.shape[0]
    v_idx = jnp.broadcast_to(jnp.arange(V)[None, :], (R, V))
    ant = x[:, v_idx, mf_idx]                             # (B, R, V)
    return jnp.prod(ant, axis=2)                          # (B, R)


if __name__ == "__main__":
    # Mimic `vars` from the ANFIS module: 3 input variables with 3, 4, 2 MFs.
    mf_num = [3, 4, 2]
    V = len(mf_num)
    M = max(mf_num)          # x provides membership values for up to M MFs/var
    B = 64                   # batch; tiled into 4 blocks of 16 below
    mf_idx_np, sel_np, R = build_selector(mf_num, M)      # R = 3*4*2 = 24 rules

    key = jax.random.PRNGKey(0)
    # Membership degrees in (0, 1), deterministic.
    x = jax.random.uniform(key, (B, V, M), dtype=jnp.float32,
                           minval=0.05, maxval=1.0)
    sel = jnp.asarray(sel_np)
    mf_idx = jnp.asarray(mf_idx_np)

    out = rules_layer(x, sel, R, block_b=16)   # grid=(4,): multi-step batch pipeline
    out = jax.block_until_ready(out)

    ref = rules_ref(x, mf_idx)
    assert out.shape == (B, R)
    np.testing.assert_allclose(np.asarray(out), np.asarray(ref),
                               rtol=1e-5, atol=1e-6)
    print("KERNEL_OK")
</pallas_src>

<mosaic_0001>
module attributes {stable_mosaic.version = 11 : i64} {
  func.func @rules_kernel(%arg0: i32, %arg1: memref<3x16x4xf32, #tpu.memory_space<vmem>>, %arg2: memref<3x4x128xf32, #tpu.memory_space<vmem>>, %arg3: memref<16x128xf32, #tpu.memory_space<vmem>>) attributes {dimension_semantics = [#tpu.dimension_semantics<parallel>], iteration_bounds = array<i64: 4>, scalar_prefetch = 0 : i64, scratch_operands = 0 : i64, tpu.core_type = #tpu.core_type<tc>, window_params = [{transform_indices = @transform_0, window_bounds = array<i64: 3, 16, 4>}, {pipeline_mode = #tpu.pipeline_mode<synchronous>, transform_indices = @transform_1, window_bounds = array<i64: 3, 4, 128>}, {transform_indices = @transform_2, window_bounds = array<i64: 16, 128>}]} {
    %c0 = arith.constant 0 : index
    %c0_0 = arith.constant 0 : index
    %c0_1 = arith.constant 0 : index
    %0 = vector.load %arg1[%c0, %c0_0, %c0_1] : memref<3x16x4xf32, #tpu.memory_space<vmem>>, vector<1x16x4xf32>
    %1 = vector.shape_cast %0 : vector<1x16x4xf32> to vector<16x4xf32>
    %c0_2 = arith.constant 0 : index
    %c0_3 = arith.constant 0 : index
    %c0_4 = arith.constant 0 : index
    %2 = vector.load %arg2[%c0_2, %c0_3, %c0_4] : memref<3x4x128xf32, #tpu.memory_space<vmem>>, vector<1x4x128xf32>
    %3 = vector.shape_cast %2 : vector<1x4x128xf32> to vector<4x128xf32>
    %4 = vector.extract_strided_slice %1 {offsets = [0, 0], sizes = [16, 1], strides = [1, 1]} : vector<16x4xf32> to vector<16x1xf32>
    %5 = vector.extract_strided_slice %3 {offsets = [0, 0], sizes = [1, 128], strides = [1, 1]} : vector<4x128xf32> to vector<1x128xf32>
    %6 = vector.broadcast %4 : vector<16x1xf32> to vector<16x128xf32>
    %7 = vector.broadcast %5 : vector<1x128xf32> to vector<16x128xf32>
    %8 = arith.mulf %6, %7 : vector<16x128xf32>
    %9 = vector.extract_strided_slice %1 {offsets = [0, 1], sizes = [16, 1], strides = [1, 1]} : vector<16x4xf32> to vector<16x1xf32>
    %10 = vector.extract_strided_slice %3 {offsets = [1, 0], sizes = [1, 128], strides = [1, 1]} : vector<4x128xf32> to vector<1x128xf32>
    %11 = vector.broadcast %9 : vector<16x1xf32> to vector<16x128xf32>
    %12 = vector.broadcast %10 : vector<1x128xf32> to vector<16x128xf32>
    %13 = arith.mulf %11, %12 : vector<16x128xf32>
    %14 = arith.addf %8, %13 : vector<16x128xf32>
    %15 = vector.extract_strided_slice %1 {offsets = [0, 2], sizes = [16, 1], strides = [1, 1]} : vector<16x4xf32> to vector<16x1xf32>
    %16 = vector.extract_strided_slice %3 {offsets = [2, 0], sizes = [1, 128], strides = [1, 1]} : vector<4x128xf32> to vector<1x128xf32>
    %17 = vector.broadcast %15 : vector<16x1xf32> to vector<16x128xf32>
    %18 = vector.broadcast %16 : vector<1x128xf32> to vector<16x128xf32>
    %19 = arith.mulf %17, %18 : vector<16x128xf32>
    %20 = arith.addf %14, %19 : vector<16x128xf32>
    %21 = vector.extract_strided_slice %1 {offsets = [0, 3], sizes = [16, 1], strides = [1, 1]} : vector<16x4xf32> to vector<16x1xf32>
    %22 = vector.extract_strided_slice %3 {offsets = [3, 0], sizes = [1, 128], strides = [1, 1]} : vector<4x128xf32> to vector<1x128xf32>
    %23 = vector.broadcast %21 : vector<16x1xf32> to vector<16x128xf32>
    %24 = vector.broadcast %22 : vector<1x128xf32> to vector<16x128xf32>
    %25 = arith.mulf %23, %24 : vector<16x128xf32>
    %26 = arith.addf %20, %25 : vector<16x128xf32>
    %c1 = arith.constant 1 : index
    %c0_5 = arith.constant 0 : index
    %c0_6 = arith.constant 0 : index
    %27 = vector.load %arg1[%c1, %c0_5, %c0_6] : memref<3x16x4xf32, #tpu.memory_space<vmem>>, vector<1x16x4xf32>
    %28 = vector.shape_cast %27 : vector<1x16x4xf32> to vector<16x4xf32>
    %c1_7 = arith.constant 1 : index
    %c0_8 = arith.constant 0 : index
    %c0_9 = arith.constant 0 : index
    %29 = vector.load %arg2[%c1_7, %c0_8, %c0_9] : memref<3x4x128xf32, #tpu.memory_space<vmem>>, vector<1x4x128xf32>
    %30 = vector.shape_cast %29 : vector<1x4x128xf32> to vector<4x128xf32>
    %31 = vector.extract_strided_slice %28 {offsets = [0, 0], sizes = [16, 1], strides = [1, 1]} : vector<16x4xf32> to vector<16x1xf32>
    %32 = vector.extract_strided_slice %30 {offsets = [0, 0], sizes = [1, 128], strides = [1, 1]} : vector<4x128xf32> to vector<1x128xf32>
    %33 = vector.broadcast %31 : vector<16x1xf32> to vector<16x128xf32>
    %34 = vector.broadcast %32 : vector<1x128xf32> to vector<16x128xf32>
    %35 = arith.mulf %33, %34 : vector<16x128xf32>
    %36 = vector.extract_strided_slice %28 {offsets = [0, 1], sizes = [16, 1], strides = [1, 1]} : vector<16x4xf32> to vector<16x1xf32>
    %37 = vector.extract_strided_slice %30 {offsets = [1, 0], sizes = [1, 128], strides = [1, 1]} : vector<4x128xf32> to vector<1x128xf32>
    %38 = vector.broadcast %36 : vector<16x1xf32> to vector<16x128xf32>
    %39 = vector.broadcast %37 : vector<1x128xf32> to vector<16x128xf32>
    %40 = arith.mulf %38, %39 : vector<16x128xf32>
    %41 = arith.addf %35, %40 : vector<16x128xf32>
    %42 = vector.extract_strided_slice %28 {offsets = [0, 2], sizes = [16, 1], strides = [1, 1]} : vector<16x4xf32> to vector<16x1xf32>
    %43 = vector.extract_strided_slice %30 {offsets = [2, 0], sizes = [1, 128], strides = [1, 1]} : vector<4x128xf32> to vector<1x128xf32>
    %44 = vector.broadcast %42 : vector<16x1xf32> to vector<16x128xf32>
    %45 = vector.broadcast %43 : vector<1x128xf32> to vector<16x128xf32>
    %46 = arith.mulf %44, %45 : vector<16x128xf32>
    %47 = arith.addf %41, %46 : vector<16x128xf32>
    %48 = vector.extract_strided_slice %28 {offsets = [0, 3], sizes = [16, 1], strides = [1, 1]} : vector<16x4xf32> to vector<16x1xf32>
    %49 = vector.extract_strided_slice %30 {offsets = [3, 0], sizes = [1, 128], strides = [1, 1]} : vector<4x128xf32> to vector<1x128xf32>
    %50 = vector.broadcast %48 : vector<16x1xf32> to vector<16x128xf32>
    %51 = vector.broadcast %49 : vector<1x128xf32> to vector<16x128xf32>
    %52 = arith.mulf %50, %51 : vector<16x128xf32>
    %53 = arith.addf %47, %52 : vector<16x128xf32>
    %54 = arith.mulf %26, %53 : vector<16x128xf32>
    %c2 = arith.constant 2 : index
    %c0_10 = arith.constant 0 : index
    %c0_11 = arith.constant 0 : index
    %55 = vector.load %arg1[%c2, %c0_10, %c0_11] : memref<3x16x4xf32, #tpu.memory_space<vmem>>, vector<1x16x4xf32>
    %56 = vector.shape_cast %55 : vector<1x16x4xf32> to vector<16x4xf32>
    %c2_12 = arith.constant 2 : index
    %c0_13 = arith.constant 0 : index
    %c0_14 = arith.constant 0 : index
    %57 = vector.load %arg2[%c2_12, %c0_13, %c0_14] : memref<3x4x128xf32, #tpu.memory_space<vmem>>, vector<1x4x128xf32>
    %58 = vector.shape_cast %57 : vector<1x4x128xf32> to vector<4x128xf32>
    %59 = vector.extract_strided_slice %56 {offsets = [0, 0], sizes = [16, 1], strides = [1, 1]} : vector<16x4xf32> to vector<16x1xf32>
    %60 = vector.extract_strided_slice %58 {offsets = [0, 0], sizes = [1, 128], strides = [1, 1]} : vector<4x128xf32> to vector<1x128xf32>
    %61 = vector.broadcast %59 : vector<16x1xf32> to vector<16x128xf32>
    %62 = vector.broadcast %60 : vector<1x128xf32> to vector<16x128xf32>
    %63 = arith.mulf %61, %62 : vector<16x128xf32>
    %64 = vector.extract_strided_slice %56 {offsets = [0, 1], sizes = [16, 1], strides = [1, 1]} : vector<16x4xf32> to vector<16x1xf32>
    %65 = vector.extract_strided_slice %58 {offsets = [1, 0], sizes = [1, 128], strides = [1, 1]} : vector<4x128xf32> to vector<1x128xf32>
    %66 = vector.broadcast %64 : vector<16x1xf32> to vector<16x128xf32>
    %67 = vector.broadcast %65 : vector<1x128xf32> to vector<16x128xf32>
    %68 = arith.mulf %66, %67 : vector<16x128xf32>
    %69 = arith.addf %63, %68 : vector<16x128xf32>
    %70 = vector.extract_strided_slice %56 {offsets = [0, 2], sizes = [16, 1], strides = [1, 1]} : vector<16x4xf32> to vector<16x1xf32>
    %71 = vector.extract_strided_slice %58 {offsets = [2, 0], sizes = [1, 128], strides = [1, 1]} : vector<4x128xf32> to vector<1x128xf32>
    %72 = vector.broadcast %70 : vector<16x1xf32> to vector<16x128xf32>
    %73 = vector.broadcast %71 : vector<1x128xf32> to vector<16x128xf32>
    %74 = arith.mulf %72, %73 : vector<16x128xf32>
    %75 = arith.addf %69, %74 : vector<16x128xf32>
    %76 = vector.extract_strided_slice %56 {offsets = [0, 3], sizes = [16, 1], strides = [1, 1]} : vector<16x4xf32> to vector<16x1xf32>
    %77 = vector.extract_strided_slice %58 {offsets = [3, 0], sizes = [1, 128], strides = [1, 1]} : vector<4x128xf32> to vector<1x128xf32>
    %78 = vector.broadcast %76 : vector<16x1xf32> to vector<16x128xf32>
    %79 = vector.broadcast %77 : vector<1x128xf32> to vector<16x128xf32>
    %80 = arith.mulf %78, %79 : vector<16x128xf32>
    %81 = arith.addf %75, %80 : vector<16x128xf32>
    %82 = arith.mulf %54, %81 : vector<16x128xf32>
    %c0_15 = arith.constant 0 : index
    %c0_16 = arith.constant 0 : index
    %83 = vector.load %arg3[%c0_15, %c0_16] : memref<16x128xf32, #tpu.memory_space<vmem>>, vector<16x128xf32>
    tpu.vector_store %arg3[%c0_15, %c0_16], %82 {strides = array<i32>} : memref<16x128xf32, #tpu.memory_space<vmem>>, vector<16x128xf32>,
    return
  }
  func.func @transform_0(%arg0: i32) -> (i32, i32, i32) {
    %c0_i32 = arith.constant 0 : i32
    %c0_i32_0 = arith.constant 0 : i32
    %c0_i32_1 = arith.constant 0 : i32
    return %c0_i32, %arg0, %c0_i32_0 : i32, i32, i32
  }
  func.func @transform_1(%arg0: i32) -> (i32, i32, i32) {
    %c0_i32 = arith.constant 0 : i32
    %c0_i32_0 = arith.constant 0 : i32
    %c0_i32_1 = arith.constant 0 : i32
    %c0_i32_2 = arith.constant 0 : i32
    return %c0_i32, %c0_i32_0, %c0_i32_1 : i32, i32, i32
  }
  func.func @transform_2(%arg0: i32) -> (i32, i32) {
    %c0_i32 = arith.constant 0 : i32
    %c0_i32_0 = arith.constant 0 : i32
    return %arg0, %c0_i32 : i32, i32
  }
}

</mosaic_0001>

<bundles_post_ra>
// kernel: tpu_custom_call.1
= control target key start
LH: loop header
LB: loop body
LE: loop exit
PB: predicated region body
PF: predicated region fallthrough
CT: control target
= control target key end

     0   :  { %7 = vsyncpa [#allocation4], 0  ;;  %s777_s0 = inlined_call_operand.vmem [shape: f32[3,64,4], index: 0, kind: input, shape index: {}]   ;;  %s778_s1 = inlined_call_operand.vmem [shape: f32[3,4,128], index: 1, kind: input, shape index: {}]   ;;  %s779_s2 = inlined_call_operand.hbm [shape: f32[64,128], index: 2, kind: output, shape index: {}]  }
   0x1   :  { %9 = vsyncpa [#allocation4 + $0x1], 0  ;;  %s659_s9 = smov 0   ;;  %s661_s10 = smov 0  }
   0x2   :  { %s663_s11 = smov 0   ;;  %s665_s12 = smov 0  }
   0x3 LB: > { %s491_s13 = sadd.s32 4294967295, %s635_s12   ;;  %s492_s14 = sadd.s32 4294967294, %s635_s12   ;;  %s635_s12 = sphi %s665_s12, %s785_s12   ;;  %s631_s11 = sphi %s663_s11, %s784_s11   ;;  %s627_s10 = sphi %s661_s10, %s783_s10   ;;  %s623_s9 = sphi %s659_s9, %s782_s9  }
   0x4   : > { %s682_s15 = sadd.s32 1, %s635_s12   ;;  %s22_s16 = sadd.s32 1, %s631_s11 }
   0x5   : > { %s19_s17 = ssub.s32 %s635_s12, %s682_s15  ;;  %p29_p0 = scmp.ne.s32.totalorder %s631_s11, %s627_s10 }
   0x6   : > { %p20_p1 = scmp.eq.s32.totalorder %s19_s17, 0  ;;  %p30_p2 = scmp.eq.s32.totalorder %s635_s12, 0 }
   0x7   : > { %p80_p3 = scmp.eq.s32.totalorder %s491_s13, 3  ;;  %p85_p4 = scmp.ne.s32.totalorder %s627_s10, %s623_s9 }
   0x8   : > { %s695_s18 = scalar_select %p20_p1, %s631_s11, %s22_s16  }
   0x9   : > { %p31_p5 = por %p30_p2, %p29_p0  ;;  %p697_p6 = por %p80_p3, %p29_p0 }
   0xa   : > { %p86_p7 = scmp.eq.s32.totalorder %s492_s14, 3  ;;  %p494_p9 = scmp.ge.s32.totalorder %s635_s12, 4 }
   0xc   : > { %p701_p8 = por %p86_p7, %p85_p4  ;;  %105 = sbr.rel (%p494_p9) target bundleno = 26 (0x1a), region = 20 }
  0x13   : > { %108 = sbr.rel (!%p31_p5) target bundleno = 26 (0x1a), region = 24  ;;  %s110_s21 = sand.u32 (%p31_p5), 1, %s631_s11  }
  0x14   : > { %s510_s22 = sshll.u32 (%p31_p5), %s635_s12, 4  ;;  %s512_s23 = smul.u32 (%p31_p5), 48, %s110_s21 }
  0x15   : > { %s115_s26 = scalar_lea.vmem (%p31_p5), %s777_s0, %s510_s22 }
  0x16   : > { %v153_v0 = vld [vmem:[%s115_s26] sm:$0xff] (%p31_p5)  ;;  %v155_v1 = vld [vmem:[%s115_s26 + $0x8] sm:$0xff] (%p31_p5)  ;;  %s112_s27 = scalar_lea.vmem (%p31_p5), [#allocation2], %s512_s23 }
  0x17   : > { %v157_v2 = vld [vmem:[%s115_s26 + $0x40] sm:$0xff] (%p31_p5)  ;;  %v159_v3 = vld [vmem:[%s115_s26 + $0x48] sm:$0xff] (%p31_p5)  ;;  %154 = vst [vmem:[%s112_s27] sm:$0xff] (%p31_p5), %v153_v0  ;;  %156 = vst [vmem:[%s112_s27 + $0x8] sm:$0xff] (%p31_p5), %v155_v1 }
  0x18   : > { %v161_v4 = vld [vmem:[%s115_s26 + $0x80] sm:$0xff] (%p31_p5)  ;;  %v163_v5 = vld [vmem:[%s115_s26 + $0x88] sm:$0xff] (%p31_p5)  ;;  %158 = vst [vmem:[%s112_s27 + $0x10] sm:$0xff] (%p31_p5), %v157_v2  ;;  %160 = vst [vmem:[%s112_s27 + $0x18] sm:$0xff] (%p31_p5), %v159_v3 }
  0x19   : > { %162 = vst [vmem:[%s112_s27 + $0x20] sm:$0xff] (%p31_p5), %v161_v4  ;;  %164 = vst [vmem:[%s112_s27 + $0x28] sm:$0xff] (%p31_p5), %v163_v5 }
  0x1a PF: > { %p497_p10 = scmp.ge.s32.totalorder %s635_s12, 1  ;;  %p169_p11 = scmp.lt.s32.totalorder %s635_s12, 5 }
  0x1c   : > { %p170_p12 = pnand %p497_p10, %p169_p11 }
  0x1d   : > { %s714_s28 = sand.u32 (!%p170_p12), 1, %s627_s10   ;;  %v637_v6 = vmov (!%p170_p12), 1   ;;  %v638_v10 = vmov (!%p170_p12), 0   ;;  %v639_v13 = vmov (!%p170_p12), 3   ;;  %v640_v14 = vmov (!%p170_p12), 2   ;;  %s511_s21 = sshll.u32 (!%p170_p12), %s491_s13, 8 }
  0x1e   : > { %173 = sbr.rel (%p170_p12) target bundleno = 248 (0xf8), region = 62  ;;  %561 = vset.pattern.permute.xlu0 (!%p170_p12), %v637_v6  ;;  %559 = vset.pattern.permute.xlu1 (!%p170_p12), %v637_v6  ;;  %v212_v29 = vlaneseq (!%p170_p12)  ;;  %v501_v36 = vld [vmem:[%s778_s1 + $0x4] sm:$0xf] (!%p170_p12)  ;;  %v201_v38 = vld [vmem:[%s778_s1] sm:$0xf] (!%p170_p12)  ;;  %s498_s14 = sshll.u32 (!%p170_p12), %s714_s28, 4 }
  0x1f   : > { %s513_s29 = smul.u32 (!%p170_p12), 48, %s714_s28  ;;  %v504_v46 = vld [vmem:[%s778_s1 + $0x8] sm:$0xf] (!%p170_p12)  ;;  %s196_s16 = scalar_lea.vmem (!%p170_p12), [#allocation3], %s498_s14 }
  0x20   : > { %v213_v32 = vshrl.u32 (!%p170_p12), %v212_v29, 7  ;;  %s424_s17 = sshll.u32 (!%p170_p12), %s196_s16, 4  ;;  %s734_s24 = scalar_lea.hbm (!%p170_p12), %s779_s2, %s511_s21  ;;  %s729_s17 = int_to_ptr.vmem [resolvable:$true] %s424_s17 }
  0x21   : > { %s178_s30 = scalar_lea.vmem (!%p170_p12), [#allocation2], %s513_s29  ;;  %s411_s25 = scalar_lea.sflag (!%p170_p12), [#allocation4], %s714_s28 }
  0x22   : > { %v499_v7 = vld [vmem:[%s178_s30 + $0x10] sm:$0xff] (!%p170_p12)  ;;  %v199_v8 = vld [vmem:[%s178_s30] sm:$0xff] (!%p170_p12)  ;;  %v200_v9 = vld [vmem:[%s178_s30 + $0x8] sm:$0xff] (!%p170_p12)  ;;  %v214_v34 = vsub.s32 (!%p170_p12), 0, %v213_v32  ;;  %v228_v35 = vsub.s32 (!%p170_p12), 1, %v213_v32  ;;  %v244_v40 = vsub.s32 (!%p170_p12), 2, %v213_v32 }
  0x23   : > { %288 = vperm.xlu0 (!%p170_p12), %561, %v499_v7   ;;  %219 = vperm.xlu1 (!%p170_p12), %559, %v199_v8   ;;  %v503_v11 = vld [vmem:[%s178_s30 + $0x28] sm:$0xff] (!%p170_p12)  ;;  %v500_v12 = vld [vmem:[%s178_s30 + $0x18] sm:$0xff] (!%p170_p12)  ;;  %v502_v15 = vld [vmem:[%s178_s30 + $0x20] sm:$0xff] (!%p170_p12)  ;;  %v260_v45 = vsub.s32 (!%p170_p12), 3, %v213_v32  ;;  %s573_s26 = scalar_lea.vmem (!%p170_p12), %s729_s17, 256  ;;  %s641_s13 = smov (!%p170_p12), [#allocation3]  }
  0x24   : > { %v215_v39 = vrot.slane (!%p170_p12), %v201_v38, %v214_v34  ;;  %v298_v42 = vrot.slane (!%p170_p12), %v501_v36, %v228_v35  ;;  %v284_v43 = vrot.slane (!%p170_p12), %v501_v36, %v214_v34  ;;  %v229_v44 = vrot.slane (!%p170_p12), %v201_v38, %v228_v35  ;;  %p574_p13 = scmp.ne.s32.totalorder (!%p170_p12), %s729_s17, %s573_s26  ;;  %s577_s27 = sshll.u32 (!%p170_p12), %s641_s13, 4  ;;  %s578_s27 = int_to_ptr.vmem [resolvable:$false] %s577_s27 }
  0x25   : > { %v245_v48 = vrot.slane %v201_v38, %v244_v40  ;;  %v314_v53 = vrot.slane %v501_v36, %v244_v40  ;;  %v369_v54 = vrot.slane %v504_v46, %v228_v35  ;;  %v355_v56 = vrot.slane %v504_v46, %v214_v34  ;;  %s579_s29 = scalar_lea.vmem %s578_s27, 512  ;;  %p580_p2 = scmp.lt.s32.totalorder %s729_s17, %s578_s27 }
  0x26   : > { %v261_v57 = vrot.slane %v201_v38, %v260_v45  ;;  %v330_v59 = vrot.slane %v501_v36, %v260_v45  ;;  %v385_v61 = vrot.slane %v504_v46, %v244_v40  ;;  %v401_v62 = vrot.slane %v504_v46, %v260_v45  ;;  %p575_p0 = pnand %p574_p13, %p697_p6  ;;  %p581_p3 = scmp.lt.s32.totalorder %s579_s29, %s573_s26 }
  0x27   : > { %562 = vset.pattern.permute.xlu0 %v638_v10  ;;  %223 = vperm.xlu1 %559, %v200_v9  }
  0x28   : > { %204 = vperm.xlu0 %562, %v199_v8   ;;  %p576_p1 = pneg %p575_p0  ;;  %p582_p4 = por %p581_p3, %p580_p2 }
  0x2a   : > { %p583_p5 = pnand %p582_p4, %p576_p1 }
  0x2b   : > { %560 = vset.pattern.permute.xlu1 %v638_v10 }
  0x2c   : > { %209 = vperm.xlu0 %562, %v200_v9   ;;  %273 = vperm.xlu1 %560, %v499_v7  }
  0x30   : > { %349 = vperm.xlu0 %562, %v503_v11   ;;  %278 = vperm.xlu1 %560, %v500_v12  }
  0x34   : > { %567 = vset.pattern.permute.xlu0 %v639_v13  ;;  %563 = vset.pattern.permute.xlu1 %v637_v6 }
  0x35   : > { %251 = vperm.xlu0 %567, %v199_v8   ;;  %292 = vperm.xlu1 %563, %v500_v12  }
  0x39   : > { %324 = vperm.xlu0 %567, %v500_v12   ;;  %564 = vset.pattern.permute.xlu1 %v640_v14 }
  0x3a   : > { %239 = vperm.xlu1 %564, %v200_v9  }
  0x3d   : > { %569 = vset.pattern.permute.xlu0 %v640_v14 }
  0x3e   : > { %235 = vperm.xlu0 %569, %v199_v8   ;;  %308 = vperm.xlu1 %564, %v500_v12  }
  0x42   : > { %304 = vperm.xlu0 %569, %v499_v7   ;;  %565 = vset.pattern.permute.xlu1 %v638_v10 }
  0x43   : > { %344 = vperm.xlu1 %565, %v502_v15  }
  0x46   : > { %379 = vperm.xlu0 %569, %v503_v11  }
  0x47   : > { %566 = vset.pattern.permute.xlu1 %v637_v6 }
  0x48   : > { %359 = vperm.xlu1 %566, %v502_v15  }
  0x4a   : > { %572 = vset.pattern.permute.xlu0 %v639_v13 }
  0x4c   : > { %363 = vperm.xlu1 %566, %v503_v11  }
  0x50   : > { %568 = vset.pattern.permute.xlu1 %v639_v13 }
  0x51   : > { %255 = vperm.xlu1 %568, %v200_v9  }
  0x55   : > { %320 = vperm.xlu1 %568, %v499_v7  }
  0x59   : > { %570 = vset.pattern.permute.xlu1 %v640_v14 }
  0x5a   : > { %375 = vperm.xlu1 %570, %v502_v15  }
  0x5e   : > { %571 = vset.pattern.permute.xlu1 %v639_v13 }
  0x5f   : > { %391 = vperm.xlu1 %571, %v502_v15  }
  0x63   : > { %395 = vperm.xlu1 %571, %v503_v11  }
  0xa2   : > { %v220_v16 = vpop.permute.xlu1 %219  ;;  %v289_v19 = vpop.permute.xlu0 %288 }
  0xa3   : > { %v299_v51 = vmul.f32 %v298_v42, %v289_v19  ;;  %v230_v55 = vmul.f32 %v229_v44, %v220_v16 }
  0xa6   : > { %v224_v17 = vpop.permute.xlu1 %223 }
  0xa7   : > { %v205_v21 = vpop.permute.xlu0 %204  ;;  %v231_v63 = vmul.f32 %v229_v44, %v224_v17 }
  0xa8   : > { %v216_v47 = vmul.f32 %v215_v39, %v205_v21 }
  0xaa   : > { %v232_v0 = vadd.f32 %v230_v55, %v216_v47 }
  0xab   : > { %v274_v18 = vpop.permute.xlu1 %273  ;;  %v210_v23 = vpop.permute.xlu0 %209 }
  0xac   : > { %v285_v52 = vmul.f32 %v284_v43, %v274_v18  ;;  %v217_v1 = vmul.f32 %v215_v39, %v210_v23 }
  0xae   : > { %v301_v3 = vadd.f32 %v299_v51, %v285_v52  ;;  %v233_v16 = vadd.f32 %v231_v63, %v217_v1 }
  0xaf   : > { %v279_v20 = vpop.permute.xlu1 %278  ;;  %v350_v25 = vpop.permute.xlu0 %349 }
  0xb0   : > { %v286_v4 = vmul.f32 %v284_v43, %v279_v20  ;;  %v357_v19 = vmul.f32 %v355_v56, %v350_v25 }
  0xb4   : > { %v293_v22 = vpop.permute.xlu1 %292  ;;  %v252_v27 = vpop.permute.xlu0 %251 }
  0xb5   : > { %v300_v2 = vmul.f32 %v298_v42, %v293_v22  ;;  %v262_v8 = vmul.f32 %v261_v57, %v252_v27 }
  0xb7   : > { %v302_v18 = vadd.f32 %v300_v2, %v286_v4 }
  0xb8   : > { %v325_v31 = vpop.permute.xlu0 %324 }
  0xb9   : > { %v240_v24 = vpop.permute.xlu1 %239  ;;  %v332_v20 = vmul.f32 %v330_v59, %v325_v31 }
  0xba   : > { %v247_v9 = vmul.f32 %v245_v48, %v240_v24 }
  0xbc   : > { %v249_v29 = vadd.f32 %v247_v9, %v233_v16 }
  0xbd   : > { %v309_v26 = vpop.permute.xlu1 %308  ;;  %v236_v37 = vpop.permute.xlu0 %235 }
  0xbe   : > { %v246_v58 = vmul.f32 %v245_v48, %v236_v37  ;;  %v316_v11 = vmul.f32 %v314_v53, %v309_v26 }
  0xc0   : > { %v248_v10 = vadd.f32 %v246_v58, %v232_v0  ;;  %v318_v32 = vadd.f32 %v316_v11, %v302_v18 }
  0xc1   : > { %v305_v49 = vpop.permute.xlu0 %304 }
  0xc2   : > { %v345_v28 = vpop.permute.xlu1 %344  ;;  %v315_v60 = vmul.f32 %v314_v53, %v305_v49  ;;  %v334_v37 = vadd.f32 %v332_v20, %v318_v32 }
  0xc3   : > { %v356_v13 = vmul.f32 %v355_v56, %v345_v28 }
  0xc4   : > { %v317_v12 = vadd.f32 %v315_v60, %v301_v3 }
  0xc5   : > { %v380_v17 = vpop.permute.xlu0 %379 }
  0xc6   : > { %v387_v27 = vmul.f32 %v385_v61, %v380_v17 }
  0xc7   : > { %v360_v30 = vpop.permute.xlu1 %359 }
  0xc8   : > { %v370_v5 = vmul.f32 %v369_v54, %v360_v30  ;;  %v264_v30 = vadd.f32 %v262_v8, %v248_v10 }
  0xca   : > { %v372_v21 = vadd.f32 %v370_v5, %v356_v13 }
  0xcb   : > { %v364_v33 = vpop.permute.xlu1 %363 }
  0xcc   : > { %v371_v14 = vmul.f32 %v369_v54, %v364_v33 }
  0xce   : > { %v373_v26 = vadd.f32 %v371_v14, %v357_v19 }
  0xd0   : > { %v256_v41 = vpop.permute.xlu1 %255  ;;  %v389_v31 = vadd.f32 %v387_v27, %v373_v26 }
  0xd1   : > { %v263_v22 = vmul.f32 %v261_v57, %v256_v41 }
  0xd3   : > { %v265_v33 = vadd.f32 %v263_v22, %v249_v29 }
  0xd4   : > { %v321_v50 = vpop.permute.xlu1 %320 }
  0xd5   : > { %v331_v6 = vmul.f32 %v330_v59, %v321_v50  ;;  %v336_v40 = vmul.f32 %v334_v37, %v265_v33 }
  0xd7   : > { %v333_v23 = vadd.f32 %v331_v6, %v317_v12 }
  0xd9   : > { %v376_v7 = vpop.permute.xlu1 %375  ;;  %v335_v35 = vmul.f32 %v333_v23, %v264_v30 }
  0xda   : > { %v386_v15 = vmul.f32 %v385_v61, %v376_v7 }
  0xdc   : > { %v388_v34 = vadd.f32 %v386_v15, %v372_v21 }
  0xde   : > { %v392_v24 = vpop.permute.xlu1 %391 }
  0xdf   : > { %v402_v28 = vmul.f32 %v401_v62, %v392_v24 }
  0xe1   : > { %v404_v36 = vadd.f32 %v402_v28, %v388_v34 }
  0xe2   : > { %v396_v25 = vpop.permute.xlu1 %395 }
  0xe3   : > { %v406_v38 = vmul.f32 %v404_v36, %v335_v35  ;;  %v403_v39 = vmul.f32 %v401_v62, %v396_v25 }
  0xe5   : > { %408 = vst [vmem:[%s196_s16] sm:$0xff] %v406_v38  ;;  %v405_v41 = vadd.f32 %v403_v39, %v389_v31 }
  0xe7   : > { %v407_v42 = vmul.f32 %v405_v41, %v336_v40 }
  0xe9   : > { %409 = vst [vmem:[%s196_s16 + $0x8] sm:$0xff] %v407_v42 }
  0xea   : > { %586 = shalt.err (!%p583_p5)
}
  0xeb   : > { %s587_s30 = scalar_lea.hbm %s734_s24, 256  ;;  %s591_s5 = scalar_lea.hbm %s779_s2, 1024 }
  0xec   : > { %p588_p7 = scmp.ne.s32.totalorder %s734_s24, %s587_s30  ;;  %p592_p11 = scmp.lt.u32.totalorder %s734_s24, %s779_s2 }
  0xed   : > { %p593_p12 = scmp.lt.u32.totalorder %s591_s5, %s587_s30  ;;  %p595_p0 = scmp.lt.u32.totalorder %s587_s30, %s734_s24 }
  0xee   : > { %p589_p9 = pnand %p588_p7, %p697_p6 }
  0xef   : > { %p594_p13 = por %p593_p12, %p592_p11 }
  0xf0   : > { %p590_p10 = pneg %p589_p9 }
  0xf1   : > { %p596_p1 = por %p595_p0, %p594_p13 }
  0xf3   : > { %p597_p2 = pnand %p596_p1, %p590_p10 }
  0xf5   : > { %600 = shalt.err (!%p597_p2)
}
  0xf6   : > { %s642_s8 = smov 128   ;;  %s643_s14 = smov 8  }
  0xf7   : > { %514 = dma.vmem_to_hbm [thread:$0]  (%p697_p6), %s729_s17, 256, %s734_s24, %s411_s25, %s642_s8, %s642_s8, %s643_s14  }
  0xf8 PF: > { %p520_p3 = scmp.ge.s32.totalorder %s635_s12, 2  ;;  %s439_s16 = sand.u32 1, %s623_s9  }
  0xf9   : > { %s440_s21 = scalar_lea.sflag [#allocation4], %s439_s16 }
  0xfa   : > { %p517_p4 = pnand %p520_p3, %p701_p8 }
  0xfc   : > { %618 = dma.done.wait (!%p517_p4), %s440_s21, 256  }
  0xfd   : > { %620 = vsyncadd (!%p517_p4), %s440_s21, 4294967040  ;;  %p12_p5 = scmp.ge.s32.totalorder %s682_s15, 6   ;;  %s782_s9 = smov %s627_s10 }
  0xfe   : > { %s783_s10 = smov %s631_s11  ;;  %s784_s11 = smov %s695_s18 }
  0xff   : > { %s785_s12 = smov %s682_s15  ;;  %14 = sbr.rel (!%p12_p5) target bundleno = 3 (0x3), region = 110 }
 0x106   :  { %445 = vsyncpa [#allocation4], 1 }
 0x107   :  { %447 = vsyncpa [#allocation4 + $0x1], 1 }

</bundles_post_ra>
